<compile_context>
chip_gen: v7x
topology: tpu7x:2x2x1
jax: 0.10.0
libtpu: 0.0.40
codegen_flags: <defaults>
</compile_context>

<pallas_src>
import jax
import jax.numpy as jnp
from jax.experimental import pallas as pl
from jax.experimental.pallas import tpu as pltpu

LEAKY_SLOPE = 0.01  # nn.LeakyReLU default negative_slope


def _leaky_relu(x):
    return jnp.where(x > 0, x, LEAKY_SLOPE * x)


def _round_up(n, m):
    return ((n + m - 1) // m) * m


def mlp_kernel(x_ref, w1_ref, b1_ref, w2_ref, b2_ref, w3_ref, b3_ref, o_ref):
    # bf16 x bf16 -> f32-accumulate matmuls on the MXU; bias add + LeakyReLU
    # in f32 on the VPU.
    x = x_ref[...].astype(jnp.bfloat16)
    h1 = jnp.dot(x, w1_ref[...], preferred_element_type=jnp.float32)
    h1 = _leaky_relu(h1 + b1_ref[...])
    h2 = jnp.dot(h1.astype(jnp.bfloat16), w2_ref[...],
                 preferred_element_type=jnp.float32)
    h2 = _leaky_relu(h2 + b2_ref[...])
    out = jnp.dot(h2.astype(jnp.bfloat16), w3_ref[...],
                  preferred_element_type=jnp.float32)
    o_ref[...] = (out + b3_ref[...]).astype(o_ref.dtype)


def world_param_classifier(x, params, *, tile_m=256):
    """x: (B, input_dim) float32. params: dict of w1,b1,w2,b2,w3,b3 (float32)."""
    B, D = x.shape
    w1, b1 = params["w1"], params["b1"]
    w2, b2 = params["w2"], params["b2"]
    w3, b3 = params["w3"], params["b3"]
    H1, H2, OUT = w1.shape[1], w2.shape[1], w3.shape[1]

    # --- lane padding: make every matmul dimension a multiple of 128 ---------
    H1p, H2p, OUTp = _round_up(H1, 128), _round_up(H2, 128), _round_up(OUT, 128)
    w1p = jnp.pad(w1, ((0, 0), (0, H1p - H1)))
    b1p = jnp.pad(b1, ((0, 0), (0, H1p - H1)))
    w2p = jnp.pad(w2, ((0, H1p - H1), (0, H2p - H2)))
    b2p = jnp.pad(b2, ((0, 0), (0, H2p - H2)))
    w3p = jnp.pad(w3, ((0, H2p - H2), (0, OUTp - OUT)))
    b3p = jnp.pad(b3, ((0, 0), (0, OUTp - OUT)))

    # bf16 weights (MXU-native); keep biases in f32 for the add.
    w1b = w1p.astype(jnp.bfloat16)
    w2b = w2p.astype(jnp.bfloat16)
    w3b = w3p.astype(jnp.bfloat16)

    # --- batch tiling: large tiles, batch padded to a tile multiple ----------
    tile_m = max(128, (tile_m // 128) * 128)      # multiple of 128 (bf16-safe)
    tile_m = min(tile_m, _round_up(B, 128))       # don't over-pad tiny batches
    Bp = _round_up(B, tile_m)
    xp = jnp.pad(x, ((0, Bp - B), (0, 0))) if Bp != B else x

    grid = (Bp // tile_m,)
    full = lambda shape: pl.BlockSpec(shape, lambda i: (0, 0))

    flops = 2 * Bp * (D * H1p + H1p * H2p + H2p * OUTp)
    bytes_accessed = (
        Bp * D * 4 + Bp * OUTp * 4                       # x tile in, out tile
        + (D * H1p + H1p * H2p + H2p * OUTp) * 2         # bf16 weights
        + (H1p + H2p + OUTp) * 4                         # f32 biases
    )

    out = pl.pallas_call(
        mlp_kernel,
        out_shape=jax.ShapeDtypeStruct((Bp, OUTp), x.dtype),
        grid_spec=pl.GridSpec(
            grid=grid,
            in_specs=[
                pl.BlockSpec((tile_m, D), lambda i: (i, 0)),  # x batch tile
                full((D, H1p)), full((1, H1p)),               # lin1
                full((H1p, H2p)), full((1, H2p)),             # lin2
                full((H2p, OUTp)), full((1, OUTp)),           # lin3
            ],
            out_specs=pl.BlockSpec((tile_m, OUTp), lambda i: (i, 0)),
        ),
        compiler_params=pltpu.CompilerParams(
            dimension_semantics=("parallel",),
        ),
        cost_estimate=pl.CostEstimate(
            flops=flops, transcendentals=0, bytes_accessed=bytes_accessed),
    )(xp, w1b, b1p, w2b, b2p, w3b, b3p)

    return out[:B, :OUT]


def init_params(key, input_dim, output_dim):
    """Deterministic synthetic parameters matching the module's layer shapes."""
    h1 = input_dim // 2
    h2 = input_dim // 4
    keys = jax.random.split(key, 6)

    def lin(kw, kb, fan_in, fan_out):
        # Kaiming-uniform-ish bound like PyTorch's Linear default init.
        bound = 1.0 / jnp.sqrt(fan_in)
        w = jax.random.uniform(kw, (fan_in, fan_out), jnp.float32, -bound, bound)
        b = jax.random.uniform(kb, (1, fan_out), jnp.float32, -bound, bound)
        return w, b

    w1, b1 = lin(keys[0], keys[1], input_dim, h1)
    w2, b2 = lin(keys[2], keys[3], h1, h2)
    w3, b3 = lin(keys[4], keys[5], h2, output_dim)
    return {"w1": w1, "b1": b1, "w2": w2, "b2": b2, "w3": w3, "b3": b3}


def reference_forward(x, p):
    h1 = _leaky_relu(x @ p["w1"] + p["b1"])
    h2 = _leaky_relu(h1 @ p["w2"] + p["b2"])
    return h2 @ p["w3"] + p["b3"]


if __name__ == "__main__":
    # Small shapes consistent with the module: input_dim=256 -> 128 -> 64 -> 60.
    BATCH, INPUT_DIM, OUTPUT_DIM = 8, 256, 60

    key = jax.random.PRNGKey(0)
    k_x, k_p = jax.random.split(key)
    x = jax.random.normal(k_x, (BATCH, INPUT_DIM), jnp.float32)
    params = init_params(k_p, INPUT_DIM, OUTPUT_DIM)

    out = world_param_classifier(x, params)
    out = jax.block_until_ready(out)

    ref = reference_forward(x, params)
    assert out.shape == (BATCH, OUTPUT_DIM)
    # bf16 matmul operands with f32 accumulation -> loosened tolerance.
    assert jnp.allclose(out, ref, atol=2e-2, rtol=2e-2)

    print("KERNEL_OK")
</pallas_src>

<mosaic_0001>
module attributes {stable_mosaic.version = 11 : i64} {
  func.func @mlp_kernel(%arg0: i32, %arg1: memref<128x256xf32, #tpu.memory_space<vmem>>, %arg2: memref<256x128xbf16, #tpu.memory_space<vmem>>, %arg3: memref<1x128xf32, #tpu.memory_space<vmem>>, %arg4: memref<128x128xbf16, #tpu.memory_space<vmem>>, %arg5: memref<1x128xf32, #tpu.memory_space<vmem>>, %arg6: memref<128x128xbf16, #tpu.memory_space<vmem>>, %arg7: memref<1x128xf32, #tpu.memory_space<vmem>>, %arg8: memref<128x128xf32, #tpu.memory_space<vmem>>) attributes {dimension_semantics = [#tpu.dimension_semantics<parallel>], iteration_bounds = array<i64: 1>, scalar_prefetch = 0 : i64, scratch_operands = 0 : i64, tpu.core_type = #tpu.core_type<tc>, window_params = [{transform_indices = @transform_0, window_bounds = array<i64: 128, 256>}, {pipeline_mode = #tpu.pipeline_mode<synchronous>, transform_indices = @transform_1, window_bounds = array<i64: 256, 128>}, {pipeline_mode = #tpu.pipeline_mode<synchronous>, transform_indices = @transform_2, window_bounds = array<i64: 1, 128>}, {pipeline_mode = #tpu.pipeline_mode<synchronous>, transform_indices = @transform_3, window_bounds = array<i64: 128, 128>}, {pipeline_mode = #tpu.pipeline_mode<synchronous>, transform_indices = @transform_4, window_bounds = array<i64: 1, 128>}, {pipeline_mode = #tpu.pipeline_mode<synchronous>, transform_indices = @transform_5, window_bounds = array<i64: 128, 128>}, {pipeline_mode = #tpu.pipeline_mode<synchronous>, transform_indices = @transform_6, window_bounds = array<i64: 1, 128>}, {transform_indices = @transform_7, window_bounds = array<i64: 128, 128>}]} {
    %c0 = arith.constant 0 : index
    %c0_0 = arith.constant 0 : index
    %0 = vector.load %arg1[%c0, %c0_0] : memref<128x256xf32, #tpu.memory_space<vmem>>, vector<128x256xf32>
    %1 = arith.truncf %0 : vector<128x256xf32> to vector<128x256xbf16>
    %c0_1 = arith.constant 0 : index
    %c0_2 = arith.constant 0 : index
    %2 = vector.load %arg2[%c0_1, %c0_2] : memref<256x128xbf16, #tpu.memory_space<vmem>>, vector<256x128xbf16>
    %cst = arith.constant dense<0.000000e+00> : vector<128x128xf32>
    %3 = tpu.matmul %1, %2, %cst {dimension_numbers = #tpu.dot_dimension_numbers<[1], [0], [0], [1], [0, 0, 1, 1], [], []>} : vector<128x256xbf16>, vector<256x128xbf16>, vector<128x128xf32> -> vector<128x128xf32>
    %c0_3 = arith.constant 0 : index
    %c0_4 = arith.constant 0 : index
    %4 = vector.load %arg3[%c0_3, %c0_4] : memref<1x128xf32, #tpu.memory_space<vmem>>, vector<1x128xf32>
    %5 = vector.broadcast %4 : vector<1x128xf32> to vector<128x128xf32>
    %6 = arith.addf %3, %5 : vector<128x128xf32>
    %cst_5 = arith.constant 0.000000e+00 : f32
    %7 = vector.broadcast %cst_5 : f32 to vector<128x128xf32>
    %8 = arith.cmpf ogt, %6, %7 : vector<128x128xf32>
    %cst_6 = arith.constant 0.00999999977 : f32
    %9 = vector.broadcast %cst_6 : f32 to vector<128x128xf32>
    %10 = arith.mulf %9, %6 : vector<128x128xf32>
    %11 = arith.select %8, %6, %10 : vector<128x128xi1>, vector<128x128xf32>
    %12 = arith.truncf %11 : vector<128x128xf32> to vector<128x128xbf16>
    %c0_7 = arith.constant 0 : index
    %c0_8 = arith.constant 0 : index
    %13 = vector.load %arg4[%c0_7, %c0_8] : memref<128x128xbf16, #tpu.memory_space<vmem>>, vector<128x128xbf16>
    %cst_9 = arith.constant dense<0.000000e+00> : vector<128x128xf32>
    %14 = tpu.matmul %12, %13, %cst_9 {dimension_numbers = #tpu.dot_dimension_numbers<[1], [0], [0], [1], [0, 0, 1, 1], [], []>} : vector<128x128xbf16>, vector<128x128xbf16>, vector<128x128xf32> -> vector<128x128xf32>
    %c0_10 = arith.constant 0 : index
    %c0_11 = arith.constant 0 : index
    %15 = vector.load %arg5[%c0_10, %c0_11] : memref<1x128xf32, #tpu.memory_space<vmem>>, vector<1x128xf32>
    %16 = vector.broadcast %15 : vector<1x128xf32> to vector<128x128xf32>
    %17 = arith.addf %14, %16 : vector<128x128xf32>
    %cst_12 = arith.constant 0.000000e+00 : f32
    %18 = vector.broadcast %cst_12 : f32 to vector<128x128xf32>
    %19 = arith.cmpf ogt, %17, %18 : vector<128x128xf32>
    %cst_13 = arith.constant 0.00999999977 : f32
    %20 = vector.broadcast %cst_13 : f32 to vector<128x128xf32>
    %21 = arith.mulf %20, %17 : vector<128x128xf32>
    %22 = arith.select %19, %17, %21 : vector<128x128xi1>, vector<128x128xf32>
    %23 = arith.truncf %22 : vector<128x128xf32> to vector<128x128xbf16>
    %c0_14 = arith.constant 0 : index
    %c0_15 = arith.constant 0 : index
    %24 = vector.load %arg6[%c0_14, %c0_15] : memref<128x128xbf16, #tpu.memory_space<vmem>>, vector<128x128xbf16>
    %cst_16 = arith.constant dense<0.000000e+00> : vector<128x128xf32>
    %25 = tpu.matmul %23, %24, %cst_16 {dimension_numbers = #tpu.dot_dimension_numbers<[1], [0], [0], [1], [0, 0, 1, 1], [], []>} : vector<128x128xbf16>, vector<128x128xbf16>, vector<128x128xf32> -> vector<128x128xf32>
    %c0_17 = arith.constant 0 : index
    %c0_18 = arith.constant 0 : index
    %26 = vector.load %arg7[%c0_17, %c0_18] : memref<1x128xf32, #tpu.memory_space<vmem>>, vector<1x128xf32>
    %27 = vector.broadcast %26 : vector<1x128xf32> to vector<128x128xf32>
    %28 = arith.addf %25, %27 : vector<128x128xf32>
    %c0_19 = arith.constant 0 : index
    %c0_20 = arith.constant 0 : index
    %29 = vector.load %arg8[%c0_19, %c0_20] : memref<128x128xf32, #tpu.memory_space<vmem>>, vector<128x128xf32>
    tpu.vector_store %arg8[%c0_19, %c0_20], %28 {strides = array<i32>} : memref<128x128xf32, #tpu.memory_space<vmem>>, vector<128x128xf32>,
    return
  }
  func.func @transform_0(%arg0: i32) -> (i32, i32) {
    %c0_i32 = arith.constant 0 : i32
    %c0_i32_0 = arith.constant 0 : i32
    return %arg0, %c0_i32 : i32, i32
  }
  func.func @transform_1(%arg0: i32) -> (i32, i32) {
    %c0_i32 = arith.constant 0 : i32
    %c0_i32_0 = arith.constant 0 : i32
    %c0_i32_1 = arith.constant 0 : i32
    return %c0_i32, %c0_i32_0 : i32, i32
  }
  func.func @transform_2(%arg0: i32) -> (i32, i32) {
    %c0_i32 = arith.constant 0 : i32
    %c0_i32_0 = arith.constant 0 : i32
    %c0_i32_1 = arith.constant 0 : i32
    return %c0_i32, %c0_i32_0 : i32, i32
  }
  func.func @transform_3(%arg0: i32) -> (i32, i32) {
    %c0_i32 = arith.constant 0 : i32
    %c0_i32_0 = arith.constant 0 : i32
    %c0_i32_1 = arith.constant 0 : i32
    return %c0_i32, %c0_i32_0 : i32, i32
  }
  func.func @transform_4(%arg0: i32) -> (i32, i32) {
    %c0_i32 = arith.constant 0 : i32
    %c0_i32_0 = arith.constant 0 : i32
    %c0_i32_1 = arith.constant 0 : i32
    return %c0_i32, %c0_i32_0 : i32, i32
  }
  func.func @transform_5(%arg0: i32) -> (i32, i32) {
    %c0_i32 = arith.constant 0 : i32
    %c0_i32_0 = arith.constant 0 : i32
    %c0_i32_1 = arith.constant 0 : i32
    return %c0_i32, %c0_i32_0 : i32, i32
  }
  func.func @transform_6(%arg0: i32) -> (i32, i32) {
    %c0_i32 = arith.constant 0 : i32
    %c0_i32_0 = arith.constant 0 : i32
    %c0_i32_1 = arith.constant 0 : i32
    return %c0_i32, %c0_i32_0 : i32, i32
  }
  func.func @transform_7(%arg0: i32) -> (i32, i32) {
    %c0_i32 = arith.constant 0 : i32
    %c0_i32_0 = arith.constant 0 : i32
    return %arg0, %c0_i32 : i32, i32
  }
}

</mosaic_0001>

<bundles_post_ra>
// kernel: tpu_custom_call.1
= control target key start
LH: loop header
LB: loop body
LE: loop exit
PB: predicated region body
PF: predicated region fallthrough
CT: control target
= control target key end

     0   :  { %12 = vsyncpa [#allocation3], 0  ;;  %s1374_s0 = inlined_call_operand.hbm [shape: f32[128,256], index: 0, kind: input, shape index: {}]   ;;  %s1375_s1 = inlined_call_operand.hbm [shape: bf16[256,128], index: 1, kind: input, shape index: {}]   ;;  %s1376_s2 = inlined_call_operand.vmem [shape: f32[1,128], index: 2, kind: input, shape index: {}]   ;;  %s1377_s3 = inlined_call_operand.hbm [shape: bf16[128,128], index: 3, kind: input, shape index: {}]   ;;  %s1378_s4 = inlined_call_operand.vmem [shape: f32[1,128], index: 4, kind: input, shape index: {}]   ;;  %s1379_s5 = inlined_call_operand.hbm [shape: bf16[128,128], index: 5, kind: input, shape index: {}]   ;;  %s1380_s6 = inlined_call_operand.vmem [shape: f32[1,128], index: 6, kind: input, shape index: {}]   ;;  %s1381_s7 = inlined_call_operand.hbm [shape: f32[128,128], index: 7, kind: output, shape index: {}]  }
   0x1   :  { %13 = vsyncpa [#allocation6], 0 }
   0x2   :  { %14 = vsyncpa [#allocation9], 0 }
   0x3   :  { %15 = vsyncpa [#allocation4], 0  ;;  %s1202_s24 = smov [#allocation5]   ;;  %s1084_s28 = scalar_lea.hbm %s1375_s1, 2048 }
   0x4   :  { %s33_s25 = sshll.u32 %s1202_s24, 4  ;;  %p1085_p0 = scmp.ne.s32.totalorder %s1375_s1, %s1084_s28  ;;  %s34_s25 = int_to_ptr.vmem [resolvable:$true] %s33_s25 }
   0x5   :  { %p1088_p1 = scmp.lt.u32.totalorder %s1084_s28, %s1375_s1 }
   0x7   :  { %p1090_p2 = pnand %p1088_p1, %p1085_p0 }
   0x9   :  { %1093 = shalt.err (!%p1090_p2)
}
   0xa   :  { %s1094_s10 = scalar_lea.vmem %s34_s25, 2048  ;;  %p1099_p4 = scmp.lt.s32.totalorder %s34_s25, %s34_s25 }
   0xb   :  { %p1095_p3 = scmp.ne.s32.totalorder %s34_s25, %s1094_s10  ;;  %p1100_p5 = scmp.lt.s32.totalorder %s1094_s10, %s1094_s10 }
   0xd   :  { %p1101_p6 = por %p1100_p5, %p1099_p4 }
   0xf   :  { %p1102_p7 = pnand %p1101_p6, %p1095_p3 }
  0x11   :  { %1105 = shalt.err (!%p1102_p7)
}
  0x12   :  { %s1203_s11 = smov 64   ;;  %s1204_s12 = smov 4  }
  0x13   :  { %39 = dma.hbm_to_vmem [thread:$0]  %s1375_s1, 2048, %s34_s25, [#allocation6], %s1203_s11, %s1203_s11, %s1204_s12  }
  0x14   :  { %s1205_s15 = smov [#allocation2]   ;;  %s1106_s19 = scalar_lea.hbm %s1374_s0, 4096 }
  0x15   :  { %s21_s16 = sshll.u32 %s1205_s15, 4  ;;  %p1107_p8 = scmp.ne.s32.totalorder %s1374_s0, %s1106_s19  ;;  %s22_s16 = int_to_ptr.vmem [resolvable:$true] %s21_s16 }
  0x16   :  { %p1110_p9 = scmp.lt.u32.totalorder %s1106_s19, %s1374_s0 }
  0x18   :  { %p1112_p10 = pnand %p1110_p9, %p1107_p8 }
  0x1a   :  { %1115 = shalt.err (!%p1112_p10)
}
  0x1b   :  { %s1116_s24 = scalar_lea.vmem %s22_s16, 4096  ;;  %p1121_p12 = scmp.lt.s32.totalorder %s22_s16, %s22_s16 }
  0x1c   :  { %p1117_p11 = scmp.ne.s32.totalorder %s22_s16, %s1116_s24  ;;  %p1122_p13 = scmp.lt.s32.totalorder %s1116_s24, %s1116_s24 }
  0x1e   :  { %p1123_p0 = por %p1122_p13, %p1121_p12 }
  0x20   :  { %p1124_p1 = pnand %p1123_p0, %p1117_p11 }
  0x22   :  { %1127 = shalt.err (!%p1124_p1)
}
  0x23   :  { %s1206_s1 = smov 256   ;;  %s1207_s25 = smov 16  }
  0x24   :  { %27 = dma.hbm_to_vmem [thread:$0]  %s1374_s0, 4096, %s22_s16, [#allocation3], %s1206_s1, %s1206_s1, %s1207_s25  }
  0x25   :  { %s1208_s28 = smov [#allocation7]   ;;  %s1209_s30 = smov [#allocation8]  }
  0x26   :  { %s47_s29 = sshll.u32 %s1208_s28, 4  ;;  %s61_s8 = sshll.u32 %s1209_s30, 4  ;;  %s48_s29 = int_to_ptr.vmem [resolvable:$true] %s47_s29  ;;  %s1280_s8 = int_to_ptr.vmem [resolvable:$true] %s61_s8 }
  0x27   :  { %s1128_s13 = scalar_lea.hbm %s1377_s3, 1024 }
  0x28   :  { %p1129_p2 = scmp.ne.s32.totalorder %s1377_s3, %s1128_s13  ;;  %p1132_p3 = scmp.lt.u32.totalorder %s1128_s13, %s1377_s3 }
  0x2a   :  { %p1134_p4 = pnand %p1132_p3, %p1129_p2 }
  0x2c   :  { %1137 = shalt.err (!%p1134_p4)
}
  0x2d   :  { %s1138_s0 = scalar_lea.vmem %s48_s29, 1024  ;;  %p1143_p6 = scmp.lt.s32.totalorder %s48_s29, %s48_s29 }
  0x2e   :  { %p1139_p5 = scmp.ne.s32.totalorder %s48_s29, %s1138_s0  ;;  %p1144_p7 = scmp.lt.s32.totalorder %s1138_s0, %s1138_s0 }
  0x30   :  { %p1145_p8 = por %p1144_p7, %p1143_p6 }
  0x32   :  { %p1146_p9 = pnand %p1145_p8, %p1139_p5 }
  0x34   :  { %1149 = shalt.err (!%p1146_p9)
}
  0x35   :  { %53 = dma.hbm_to_vmem [thread:$0]  %s1377_s3, 1024, %s48_s29, [#allocation6], %s1203_s11, %s1203_s11, %s1204_s12  }
  0x36   :  { %s1150_s22 = scalar_lea.hbm %s1379_s5, 1024 }
  0x37   :  { %p1151_p10 = scmp.ne.s32.totalorder %s1379_s5, %s1150_s22  ;;  %p1154_p11 = scmp.lt.u32.totalorder %s1150_s22, %s1379_s5 }
  0x39   :  { %p1156_p12 = pnand %p1154_p11, %p1151_p10 }
  0x3b   :  { %1159 = shalt.err (!%p1156_p12)
}
  0x3c   :  { %s1160_s26 = scalar_lea.vmem %s1280_s8, 1024  ;;  %p1165_p0 = scmp.lt.s32.totalorder %s1280_s8, %s1280_s8 }
  0x3d   :  { %p1161_p13 = scmp.ne.s32.totalorder %s1280_s8, %s1160_s26  ;;  %p1166_p1 = scmp.lt.s32.totalorder %s1160_s26, %s1160_s26 }
  0x3f   :  { %p1167_p2 = por %p1166_p1, %p1165_p0 }
  0x41   :  { %p1168_p3 = pnand %p1167_p2, %p1161_p13 }
  0x43   :  { %1171 = shalt.err (!%p1168_p3)
}
  0x44   :  { %67 = dma.hbm_to_vmem [thread:$0]  %s1379_s5, 1024, %s1280_s8, [#allocation9], %s1203_s11, %s1203_s11, %s1204_s12  }
  0x45   :  { %1194 = dma.done.wait [#allocation3], 4096  }
  0x46   :  { %1195 = vsyncadd [#allocation3], 4294963200 }
  0x47   :  { %1196 = dma.done.wait [#allocation6], 3072  }
  0x48   :  { %1197 = vsyncadd [#allocation6], 4294964224 }
  0x49   :  { %1198 = dma.done.wait [#allocation9], 1024  }
  0x4a   :  { %1199 = vsyncadd [#allocation9], 4294966272  ;;  %v1052_v0 = vld [vmem:[#allocation5 + $0x40] sm:$0xff]   ;;  %v1054_v2 = vld [vmem:[#allocation5 + $0x48] sm:$0xff]  }
  0x4b   :  { %v1053_v1 = vld [vmem:[#allocation5] sm:$0xff]   ;;  %881 = vmatprep.subr.bf16.mxu0 %v1052_v0  ;;  %v1055_v3 = vld [vmem:[#allocation5 + $0x8] sm:$0xff]   ;;  %v1056_v4 = vld [vmem:[#allocation5 + $0x50] sm:$0xff]  }
  0x4c   :  { %882 = vmatpush3.bf16.msra.mxu0 %v1053_v1  ;;  %v1057_v5 = vld [vmem:[#allocation5 + $0x10] sm:$0xff]   ;;  %v1058_v6 = vld [vmem:[#allocation5 + $0x58] sm:$0xff]   ;;  %v1060_v8 = vld [vmem:[#allocation5 + $0x60] sm:$0xff]  }
  0x4d   :  { %883 = vmatprep.subr.bf16.mxu0 %v1054_v2  ;;  %v1059_v7 = vld [vmem:[#allocation5 + $0x18] sm:$0xff]   ;;  %v1061_v9 = vld [vmem:[#allocation5 + $0x20] sm:$0xff]   ;;  %v1062_v10 = vld [vmem:[#allocation5 + $0x68] sm:$0xff]  }
  0x4e   :  { %v84_v11 = vld [vmem:[#allocation2 + $0x8] sm:$0xff]  ;;  %v86_v12 = vld [vmem:[#allocation2 + $0x18] sm:$0xff]  ;;  %v1064_v15 = vld [vmem:[#allocation5 + $0x70] sm:$0xff]  }
  0x4f   :  { %v116_v13 = vpack.c.bf16 %v86_v12, %v84_v11  ;;  %v1063_v14 = vld [vmem:[#allocation5 + $0x28] sm:$0xff]   ;;  %v1065_v16 = vld [vmem:[#allocation5 + $0x30] sm:$0xff]   ;;  %v1066_v17 = vld [vmem:[#allocation5 + $0x78] sm:$0xff]  }
  0x50   :  { %884 = vmatpush3.bf16.msra.mxu0 %v1055_v3  ;;  %v1067_v18 = vld [vmem:[#allocation5 + $0x38] sm:$0xff]   ;;  %v83_v19 = vld [vmem:[#allocation2] sm:$0xff]  ;;  %v85_v20 = vld [vmem:[#allocation2 + $0x10] sm:$0xff] }
  0x51   :  { %885 = vmatprep.subr.bf16.mxu0 %v1056_v4  ;;  %298 = vmatprep.mubr.bf16.mxu0 %v116_v13  ;;  %v88_v21 = vld [vmem:[#allocation2 + $0x28] sm:$0xff]  ;;  %v90_v22 = vld [vmem:[#allocation2 + $0x38] sm:$0xff]  ;;  %v1068_v23 = vld [vmem:[#allocation7] sm:$0xff]   ;;  %v115_v26 = vpack.c.bf16 %v85_v20, %v83_v19 }
  0x52   :  { %v1069_v24 = vld [vmem:[#allocation7 + $0x8] sm:$0xff]   ;;  %977 = vmatprep.subr.bf16.mxu1 %v1068_v23  ;;  %v1070_v25 = vld [vmem:[#allocation7 + $0x10] sm:$0xff]   ;;  %v118_v27 = vpack.c.bf16 %v90_v22, %v88_v21  ;;  %v87_v28 = vld [vmem:[#allocation2 + $0x20] sm:$0xff] }
  0x53   :  { %978 = vmatpush3.bf16.msra.mxu1 %v1068_v23  ;;  %v89_v29 = vld [vmem:[#allocation2 + $0x30] sm:$0xff]  ;;  %v92_v30 = vld [vmem:[#allocation2 + $0x48] sm:$0xff]  ;;  %v94_v31 = vld [vmem:[#allocation2 + $0x58] sm:$0xff] }
  0x54   :  { %886 = vmatpush3.bf16.msra.mxu0 %v1057_v5  ;;  %979 = vmatprep.subr.bf16.mxu1 %v1069_v24  ;;  %v117_v32 = vpack.c.bf16 %v89_v29, %v87_v28  ;;  %v120_v33 = vpack.c.bf16 %v94_v31, %v92_v30  ;;  %v91_v34 = vld [vmem:[#allocation2 + $0x40] sm:$0xff]  ;;  %v93_v35 = vld [vmem:[#allocation2 + $0x50] sm:$0xff]  ;;  %v96_v36 = vld [vmem:[#allocation2 + $0x68] sm:$0xff] }
  0x55   :  { %887 = vmatprep.subr.bf16.mxu0 %v1058_v6  ;;  %v98_v37 = vld [vmem:[#allocation2 + $0x78] sm:$0xff]  ;;  %v119_v38 = vpack.c.bf16 %v93_v35, %v91_v34  ;;  %v95_v40 = vld [vmem:[#allocation2 + $0x60] sm:$0xff]  ;;  %v97_v41 = vld [vmem:[#allocation2 + $0x70] sm:$0xff] }
  0x56   :  { %v122_v39 = vpack.c.bf16 %v98_v37, %v96_v36  ;;  %v100_v42 = vld [vmem:[#allocation2 + $0x88] sm:$0xff]  ;;  %v102_v43 = vld [vmem:[#allocation2 + $0x98] sm:$0xff]  ;;  %v121_v44 = vpack.c.bf16 %v97_v41, %v95_v40  ;;  %v99_v46 = vld [vmem:[#allocation2 + $0x80] sm:$0xff] }
  0x57   :  { %980 = vmatpush3.bf16.msra.mxu1 %v1069_v24  ;;  %v124_v45 = vpack.c.bf16 %v102_v43, %v100_v42  ;;  %v101_v47 = vld [vmem:[#allocation2 + $0x90] sm:$0xff]  ;;  %v104_v48 = vld [vmem:[#allocation2 + $0xa8] sm:$0xff]  ;;  %v106_v49 = vld [vmem:[#allocation2 + $0xb8] sm:$0xff] }
  0x58   :  { %888 = vmatpush3.bf16.msra.mxu0 %v1059_v7  ;;  %981 = vmatprep.subr.bf16.mxu1 %v1070_v25  ;;  %v123_v50 = vpack.c.bf16 %v101_v47, %v99_v46  ;;  %v126_v51 = vpack.c.bf16 %v106_v49, %v104_v48  ;;  %v103_v52 = vld [vmem:[#allocation2 + $0xa0] sm:$0xff]  ;;  %v105_v53 = vld [vmem:[#allocation2 + $0xb0] sm:$0xff]  ;;  %v108_v54 = vld [vmem:[#allocation2 + $0xc8] sm:$0xff] }
  0x59   :  { %889 = vmatprep.subr.bf16.mxu0 %v1060_v8  ;;  %v110_v55 = vld [vmem:[#allocation2 + $0xd8] sm:$0xff]  ;;  %v125_v56 = vpack.c.bf16 %v105_v53, %v103_v52  ;;  %v107_v58 = vld [vmem:[#allocation2 + $0xc0] sm:$0xff]  ;;  %v109_v59 = vld [vmem:[#allocation2 + $0xd0] sm:$0xff] }
  0x5a   :  { %v128_v57 = vpack.c.bf16 %v110_v55, %v108_v54  ;;  %v112_v60 = vld [vmem:[#allocation2 + $0xe8] sm:$0xff]  ;;  %v114_v61 = vld [vmem:[#allocation2 + $0xf8] sm:$0xff]  ;;  %v127_v62 = vpack.c.bf16 %v109_v59, %v107_v58  ;;  %v111_v0 = vld [vmem:[#allocation2 + $0xe0] sm:$0xff] }
  0x5b   :  { %982 = vmatpush3.bf16.msra.mxu1 %v1070_v25  ;;  %v130_v63 = vpack.c.bf16 %v114_v61, %v112_v60  ;;  %v113_v1 = vld [vmem:[#allocation2 + $0xf0] sm:$0xff]  ;;  %v1071_v3 = vld [vmem:[#allocation7 + $0x18] sm:$0xff]   ;;  %v1072_v4 = vld [vmem:[#allocation7 + $0x20] sm:$0xff]  }
  0x5c   :  { %890 = vmatpush3.bf16.msra.mxu0 %v1061_v9  ;;  %v129_v2 = vpack.c.bf16 %v113_v1, %v111_v0  ;;  %983 = vmatprep.subr.bf16.mxu1 %v1071_v3  ;;  %v1073_v5 = vld [vmem:[#allocation7 + $0x28] sm:$0xff]   ;;  %v1074_v6 = vld [vmem:[#allocation7 + $0x30] sm:$0xff]   ;;  %v1075_v7 = vld [vmem:[#allocation7 + $0x38] sm:$0xff]  }
  0x5d   :  { %891 = vmatprep.subr.bf16.mxu0 %v1062_v10  ;;  %v1076_v8 = vld [vmem:[#allocation8] sm:$0xff]   ;;  %v1077_v41 = vld [vmem:[#allocation8 + $0x8] sm:$0xff]   ;;  %v1078_v46 = vld [vmem:[#allocation8 + $0x10] sm:$0xff]  }
  0x5e   :  { %v1320_v10 = vld [vmem:[%s1376_s2] ss:$0 sm:$0xff] }
  0x5f   :  { %984 = vmatpush3.bf16.msra.mxu1 %v1071_v3  ;;  %v1080_v61 = vld [vmem:[#allocation8 + $0x20] sm:$0xff]  }
  0x60   :  { %892 = vmatpush3.bf16.msra.mxu0 %v1063_v14  ;;  %985 = vmatprep.subr.bf16.mxu1 %v1072_v4 }
  0x61   :  { %893 = vmatprep.subr.bf16.mxu0 %v1064_v15 }
  0x63   :  { %986 = vmatpush3.bf16.msra.mxu1 %v1072_v4 }
  0x64   :  { %894 = vmatpush3.bf16.msra.mxu0 %v1065_v16  ;;  %987 = vmatprep.subr.bf16.mxu1 %v1073_v5 }
  0x65   :  { %895 = vmatprep.subr.bf16.mxu0 %v1066_v17 }
  0x67   :  { %988 = vmatpush3.bf16.msra.mxu1 %v1073_v5 }
  0x68   :  { %896 = vmatpush3.bf16.msra.mxu0 %v1067_v18  ;;  %989 = vmatprep.subr.bf16.mxu1 %v1074_v6 }
  0x6b   :  { %299 = vmatmul.mubr.bf16.vlgmr.msra.gmra.mrb[0].mxu0 %v115_v26  ;;  %990 = vmatpush3.bf16.msra.mxu1 %v1074_v6 }
  0x6c   :  { %306 = vmatprep.mubr.bf16.mxu0 %v118_v27  ;;  %991 = vmatprep.subr.bf16.mxu1 %v1075_v7 }
  0x6f   :  { %992 = vmatpush3.bf16.msra.mxu1 %v1075_v7 }
  0x70   :  { %1009 = vmatprep.subr.bf16.mxu1 %v1076_v8 }
  0x73   :  { %307 = vmatmul.mubr.bf16.gmra.mrb[4].mxu0 %v117_v32 }
  0x74   :  { %314 = vmatprep.mubr.bf16.mxu0 %v120_v33 }
  0x7b   :  { %315 = vmatmul.mubr.bf16.gmra.mrb[8].mxu0 %v119_v38 }
  0x7c   :  { %322 = vmatprep.mubr.bf16.mxu0 %v122_v39 }
  0x83   :  { %323 = vmatmul.mubr.bf16.gmra.mrb[12].mxu0 %v121_v44 }
  0x84   :  { %330 = vmatprep.mubr.bf16.mxu0 %v124_v45 }
  0x8b   :  { %331 = vmatmul.mubr.bf16.gmra.mrb[16].mxu0 %v123_v50 }
  0x8c   :  { %338 = vmatprep.mubr.bf16.mxu0 %v126_v51 }
  0x93   :  { %339 = vmatmul.mubr.bf16.gmra.mrb[20].mxu0 %v125_v56  ;;  %v1079_v56 = vld [vmem:[#allocation8 + $0x18] sm:$0xff]  }
  0x94   :  { %346 = vmatprep.mubr.bf16.mxu0 %v128_v57 }
  0x9b   :  { %347 = vmatmul.mubr.bf16.gmra.mrb[24].mxu0 %v127_v62 }
  0x9c   :  { %354 = vmatprep.mubr.bf16.mxu0 %v130_v63 }
  0xa3   :  { %355 = vmatmul.mubr.bf16.gmra.mrb[28].mxu0 %v129_v2 }
 0x13e   :  { %v897_v9 = vpop.f32.mrb[0].mxu0 }
 0x13f   :  { %v898_v11 = vpop.f32.mrb[1].mxu0 }
 0x140   :  { %v899_v12 = vadd.f32 %v898_v11, %v897_v9  ;;  %v900_v13 = vpop.f32.mrb[2].mxu0 }
 0x141   :  { %v901_v14 = vpop.f32.mrb[3].mxu0 }
 0x142   :  { %v301_v15 = vadd.f32 %v899_v12, %v1320_v10  ;;  %v902_v16 = vadd.f32 %v901_v14, %v900_v13 }
 0x144   :  { %v304_v17 = vadd.f32 %v902_v16, %v1320_v10  ;;  %v379_v18 = vmul.f32 0.01, %v301_v15  ;;  %vm363_vm0 = vcmp.gt.f32.partialorder %v301_v15, 0.0 }
 0x146   :  { %v903_v19 = vpop.f32.mrb[4].mxu0  ;;  %vm364_vm1 = vcmp.gt.f32.partialorder %v304_v17, 0.0  ;;  %v380_v20 = vmul.f32 0.01, %v304_v17  ;;  %v395_v24 = vsel %vm363_vm0, %v301_v15, %v379_v18 }
 0x147   :  { %v904_v21 = vpop.f32.mrb[5].mxu0 }
 0x148   :  { %v905_v22 = vadd.f32 %v904_v21, %v903_v19  ;;  %v906_v23 = vpop.f32.mrb[6].mxu0  ;;  %v396_v25 = vsel %vm364_vm1, %v304_v17, %v380_v20 }
 0x149   :  { %v907_v26 = vpop.f32.mrb[7].mxu0  ;;  %v411_v27 = vpack.c.bf16 %v396_v25, %v395_v24 }
 0x14a   :  { %v309_v28 = vadd.f32 %v905_v22, %v1320_v10  ;;  %v908_v29 = vadd.f32 %v907_v26, %v906_v23 }
 0x14b   :  { %993 = vmatprep.mubr.bf16.mxu1 %v411_v27 }
 0x14c   :  { %v381_v30 = vmul.f32 0.01, %v309_v28  ;;  %v312_v31 = vadd.f32 %v908_v29, %v1320_v10  ;;  %vm365_vm2 = vcmp.gt.f32.partialorder %v309_v28, 0.0 }
 0x14e   :  { %vm366_vm3 = vcmp.gt.f32.partialorder %v312_v31, 0.0  ;;  %v382_v32 = vmul.f32 0.01, %v312_v31  ;;  %v909_v33 = vpop.f32.mrb[8].mxu0  ;;  %v397_v37 = vsel %vm365_vm2, %v309_v28, %v381_v30 }
 0x14f   :  { %v910_v34 = vpop.f32.mrb[9].mxu0 }
 0x150   :  { %v911_v35 = vadd.f32 %v910_v34, %v909_v33  ;;  %v912_v36 = vpop.f32.mrb[10].mxu0  ;;  %v398_v38 = vsel %vm366_vm3, %v312_v31, %v382_v32 }
 0x151   :  { %v913_v39 = vpop.f32.mrb[11].mxu0  ;;  %v412_v40 = vpack.c.bf16 %v398_v38, %v397_v37 }
 0x152   :  { %v317_v42 = vadd.f32 %v911_v35, %v1320_v10  ;;  %v914_v43 = vadd.f32 %v913_v39, %v912_v36 }
 0x153   :  { %994 = vmatmul.mubr.bf16.vlgmr.msra.gmra.mrb[0].mxu1 %v412_v40 }
 0x154   :  { %v383_v44 = vmul.f32 0.01, %v317_v42  ;;  %v320_v45 = vadd.f32 %v914_v43, %v1320_v10  ;;  %1010 = vmatpush3.bf16.msra.mxu1 %v1076_v8  ;;  %vm367_vm4 = vcmp.gt.f32.partialorder %v317_v42, 0.0 }
 0x155   :  { %1011 = vmatprep.subr.bf16.mxu1 %v1077_v41 }
 0x156   :  { %vm368_vm5 = vcmp.gt.f32.partialorder %v320_v45, 0.0  ;;  %v384_v47 = vmul.f32 0.01, %v320_v45  ;;  %v915_v48 = vpop.f32.mrb[12].mxu0  ;;  %v399_v52 = vsel %vm367_vm4, %v317_v42, %v383_v44 }
 0x157   :  { %v916_v49 = vpop.f32.mrb[13].mxu0 }
 0x158   :  { %v917_v50 = vadd.f32 %v916_v49, %v915_v48  ;;  %v918_v51 = vpop.f32.mrb[14].mxu0  ;;  %v400_v53 = vsel %vm368_vm5, %v320_v45, %v384_v47  ;;  %1012 = vmatpush3.bf16.msra.mxu1 %v1077_v41 }
 0x159   :  { %v919_v54 = vpop.f32.mrb[15].mxu0  ;;  %v413_v55 = vpack.c.bf16 %v400_v53, %v399_v52  ;;  %1013 = vmatprep.subr.bf16.mxu1 %v1078_v46 }
 0x15a   :  { %v325_v57 = vadd.f32 %v917_v50, %v1320_v10  ;;  %v920_v58 = vadd.f32 %v919_v54, %v918_v51 }
 0x15b   :  { %997 = vmatprep.mubr.bf16.mxu1 %v413_v55  ;;  %v1081_v55 = vld [vmem:[#allocation8 + $0x28] sm:$0xff]  }
 0x15c   :  { %v385_v59 = vmul.f32 0.01, %v325_v57  ;;  %v328_v60 = vadd.f32 %v920_v58, %v1320_v10  ;;  %1014 = vmatpush3.bf16.msra.mxu1 %v1078_v46  ;;  %vm369_vm6 = vcmp.gt.f32.partialorder %v325_v57, 0.0 }
 0x15d   :  { %1015 = vmatprep.subr.bf16.mxu1 %v1079_v56 }
 0x15e   :  { %vm370_vm7 = vcmp.gt.f32.partialorder %v328_v60, 0.0  ;;  %v386_v62 = vmul.f32 0.01, %v328_v60  ;;  %v921_v63 = vpop.f32.mrb[16].mxu0  ;;  %v401_v3 = vsel %vm369_vm6, %v325_v57, %v385_v59  ;;  %v1083_v57 = vld [vmem:[#allocation8 + $0x38] sm:$0xff]  }
 0x15f   :  { %v922_v0 = vpop.f32.mrb[17].mxu0 }
 0x160   :  { %v923_v1 = vadd.f32 %v922_v0, %v921_v63  ;;  %v924_v2 = vpop.f32.mrb[18].mxu0  ;;  %v402_v4 = vsel %vm370_vm7, %v328_v60, %v386_v62  ;;  %1016 = vmatpush3.bf16.msra.mxu1 %v1079_v56  ;;  %v1082_v56 = vld [vmem:[#allocation8 + $0x30] sm:$0xff]  }
 0x161   :  { %v925_v5 = vpop.f32.mrb[19].mxu0  ;;  %v414_v6 = vpack.c.bf16 %v402_v4, %v401_v3  ;;  %1017 = vmatprep.subr.bf16.mxu1 %v1080_v61 }
 0x162   :  { %v333_v7 = vadd.f32 %v923_v1, %v1320_v10  ;;  %v926_v8 = vadd.f32 %v925_v5, %v924_v2 }
 0x163   :  { %998 = vmatmul.mubr.bf16.gmra.mrb[4].mxu1 %v414_v6 }
 0x164   :  { %v387_v9 = vmul.f32 0.01, %v333_v7  ;;  %v336_v11 = vadd.f32 %v926_v8, %v1320_v10  ;;  %1018 = vmatpush3.bf16.msra.mxu1 %v1080_v61  ;;  %vm371_vm8 = vcmp.gt.f32.partialorder %v333_v7, 0.0 }
 0x165   :  { %1019 = vmatprep.subr.bf16.mxu1 %v1081_v55 }
 0x166   :  { %vm372_vm9 = vcmp.gt.f32.partialorder %v336_v11, 0.0  ;;  %v388_v12 = vmul.f32 0.01, %v336_v11  ;;  %v927_v13 = vpop.f32.mrb[20].mxu0  ;;  %v403_v17 = vsel %vm371_vm8, %v333_v7, %v387_v9 }
 0x167   :  { %v928_v14 = vpop.f32.mrb[21].mxu0 }
 0x168   :  { %v929_v15 = vadd.f32 %v928_v14, %v927_v13  ;;  %v930_v16 = vpop.f32.mrb[22].mxu0  ;;  %v404_v18 = vsel %vm372_vm9, %v336_v11, %v388_v12  ;;  %1020 = vmatpush3.bf16.msra.mxu1 %v1081_v55 }
 0x169   :  { %v931_v19 = vpop.f32.mrb[23].mxu0  ;;  %v415_v20 = vpack.c.bf16 %v404_v18, %v403_v17  ;;  %1021 = vmatprep.subr.bf16.mxu1 %v1082_v56 }
 0x16a   :  { %v341_v21 = vadd.f32 %v929_v15, %v1320_v10  ;;  %v932_v22 = vadd.f32 %v931_v19, %v930_v16 }
 0x16b   :  { %1001 = vmatprep.mubr.bf16.mxu1 %v415_v20 }
 0x16c   :  { %v389_v23 = vmul.f32 0.01, %v341_v21  ;;  %v344_v24 = vadd.f32 %v932_v22, %v1320_v10  ;;  %vm373_vm10 = vcmp.gt.f32.partialorder %v341_v21, 0.0  ;;  %1022 = vmatpush3.bf16.msra.mxu1 %v1082_v56 }
 0x16d   :  { %1023 = vmatprep.subr.bf16.mxu1 %v1083_v57 }
 0x16e   :  { %vm374_vm11 = vcmp.gt.f32.partialorder %v344_v24, 0.0  ;;  %v390_v25 = vmul.f32 0.01, %v344_v24  ;;  %v933_v26 = vpop.f32.mrb[24].mxu0  ;;  %v405_v30 = vsel %vm373_vm10, %v341_v21, %v389_v23 }
 0x16f   :  { %v934_v27 = vpop.f32.mrb[25].mxu0 }
 0x170   :  { %v935_v28 = vadd.f32 %v934_v27, %v933_v26  ;;  %v936_v29 = vpop.f32.mrb[26].mxu0  ;;  %v406_v31 = vsel %vm374_vm11, %v344_v24, %v390_v25  ;;  %1024 = vmatpush3.bf16.msra.mxu1 %v1083_v57 }
 0x171   :  { %v937_v32 = vpop.f32.mrb[27].mxu0  ;;  %v416_v33 = vpack.c.bf16 %v406_v31, %v405_v30 }
 0x172   :  { %v349_v34 = vadd.f32 %v935_v28, %v1320_v10  ;;  %v938_v35 = vadd.f32 %v937_v32, %v936_v29 }
 0x173   :  { %1002 = vmatmul.mubr.bf16.gmra.mrb[8].mxu1 %v416_v33 }
 0x174   :  { %v391_v36 = vmul.f32 0.01, %v349_v34  ;;  %v352_v37 = vadd.f32 %v938_v35, %v1320_v10  ;;  %vm375_vm12 = vcmp.gt.f32.partialorder %v349_v34, 0.0 }
 0x176   :  { %vm376_vm13 = vcmp.gt.f32.partialorder %v352_v37, 0.0  ;;  %v392_v38 = vmul.f32 0.01, %v352_v37  ;;  %v939_v39 = vpop.f32.mrb[28].mxu0  ;;  %v407_v43 = vsel %vm375_vm12, %v349_v34, %v391_v36 }
 0x177   :  { %v940_v40 = vpop.f32.mrb[29].mxu0 }
 0x178   :  { %v941_v41 = vadd.f32 %v940_v40, %v939_v39  ;;  %v942_v42 = vpop.f32.mrb[30].mxu0  ;;  %v408_v44 = vsel %vm376_vm13, %v352_v37, %v392_v38 }
 0x179   :  { %v943_v45 = vpop.f32.mrb[31].mxu0  ;;  %v417_v46 = vpack.c.bf16 %v408_v44, %v407_v43 }
 0x17a   :  { %v357_v47 = vadd.f32 %v941_v41, %v1320_v10  ;;  %v944_v48 = vadd.f32 %v943_v45, %v942_v42 }
 0x17b   :  { %1005 = vmatprep.mubr.bf16.mxu1 %v417_v46 }
 0x17c   :  { %v393_v49 = vmul.f32 0.01, %v357_v47  ;;  %v360_v50 = vadd.f32 %v944_v48, %v1320_v10  ;;  %vm377_vm14 = vcmp.gt.f32.partialorder %v357_v47, 0.0  ;;  %v1341_v10 = vld [vmem:[%s1378_s4] ss:$0 sm:$0xff] }
 0x17e   :  { %vm378_vm15 = vcmp.gt.f32.partialorder %v360_v50, 0.0  ;;  %v394_v51 = vmul.f32 0.01, %v360_v50  ;;  %v409_v52 = vsel %vm377_vm14, %v357_v47, %v393_v49 }
 0x180   :  { %v410_v53 = vsel %vm378_vm15, %v360_v50, %v394_v51 }
 0x181   :  { %v418_v54 = vpack.c.bf16 %v410_v53, %v409_v52 }
 0x183   :  { %1006 = vmatmul.mubr.bf16.gmra.mrb[12].mxu1 %v418_v54 }
 0x226   :  { %v995_v58 = vpop.f32.mrb[0].mxu1 }
 0x227   :  { %v533_v59 = vadd.f32 %v995_v58, %v1341_v10  ;;  %v524_v60 = vpop.f32.mrb[1].mxu1 }
 0x228   :  { %v525_v61 = vadd.f32 %v1341_v10, %v524_v60  ;;  %v996_v62 = vpop.f32.mrb[2].mxu1 }
 0x229   :  { %v605_v63 = vmul.f32 0.01, %v533_v59  ;;  %v536_v0 = vadd.f32 %v996_v62, %v1341_v10  ;;  %v527_v1 = vpop.f32.mrb[3].mxu1  ;;  %vm589_vm0 = vcmp.gt.f32.partialorder %v533_v59, 0.0 }
 0x22a   :  { %v603_v2 = vmul.f32 0.01, %v525_v61  ;;  %v528_v3 = vadd.f32 %v1341_v10, %v527_v1  ;;  %vm587_vm1 = vcmp.gt.f32.partialorder %v525_v61, 0.0 }
 0x22b   :  { %vm590_vm2 = vcmp.gt.f32.partialorder %v536_v0, 0.0  ;;  %v606_v4 = vmul.f32 0.01, %v536_v0  ;;  %v621_v6 = vsel %vm589_vm0, %v533_v59, %v605_v63 }
 0x22c   :  { %vm588_vm3 = vcmp.gt.f32.partialorder %v528_v3, 0.0  ;;  %v604_v5 = vmul.f32 0.01, %v528_v3  ;;  %v619_v9 = vsel %vm587_vm1, %v525_v61, %v603_v2 }
 0x22d   :  { %v622_v7 = vsel %vm590_vm2, %v536_v0, %v606_v4 }
 0x22e   :  { %v636_v8 = vpack.c.bf16 %v622_v7, %v621_v6  ;;  %v620_v11 = vsel %vm588_vm3, %v528_v3, %v604_v5  ;;  %v872_v3 = vld [vmem:[%s1380_s6] ss:$0 sm:$0xff]  ;;  %s1210_s6 = smov [#allocation10]  }
 0x22f   :  { %v635_v12 = vpack.c.bf16 %v620_v11, %v619_v9  ;;  %s832_s29 = sshll.u32 %s1210_s6, 4  ;;  %s833_s29 = int_to_ptr.vmem [resolvable:$true] %s832_s29 }
 0x230   :  { %s1172_s30 = scalar_lea.vmem %s833_s29, 2048  ;;  %p1177_p5 = scmp.lt.s32.totalorder %s833_s29, %s833_s29 }
 0x231   :  { %1025 = vmatprep.mubr.bf16.mxu1 %v635_v12  ;;  %p1173_p4 = scmp.ne.s32.totalorder %s833_s29, %s1172_s30  ;;  %p1178_p6 = scmp.lt.s32.totalorder %s1172_s30, %s1172_s30 }
 0x232   :  { %1026 = vmatmul.mubr.bf16.vlgmr.msra.gmra.mrb[16].mxu1 %v636_v8 }
 0x233   :  { %p1179_p7 = por %p1178_p6, %p1177_p5 }
 0x235   :  { %p1180_p8 = pnand %p1179_p7, %p1173_p4 }
 0x236   :  { %v999_v13 = vpop.f32.mrb[4].mxu1 }
 0x237   :  { %v549_v14 = vadd.f32 %v999_v13, %v1341_v10  ;;  %v540_v15 = vpop.f32.mrb[5].mxu1 }
 0x238   :  { %v541_v16 = vadd.f32 %v1341_v10, %v540_v15  ;;  %v1000_v17 = vpop.f32.mrb[6].mxu1 }
 0x239   :  { %v609_v18 = vmul.f32 0.01, %v549_v14  ;;  %v552_v19 = vadd.f32 %v1000_v17, %v1341_v10  ;;  %v543_v20 = vpop.f32.mrb[7].mxu1  ;;  %vm593_vm4 = vcmp.gt.f32.partialorder %v549_v14, 0.0 }
 0x23a   :  { %v607_v21 = vmul.f32 0.01, %v541_v16  ;;  %v544_v22 = vadd.f32 %v1341_v10, %v543_v20  ;;  %vm591_vm5 = vcmp.gt.f32.partialorder %v541_v16, 0.0 }
 0x23b   :  { %vm594_vm6 = vcmp.gt.f32.partialorder %v552_v19, 0.0  ;;  %v610_v23 = vmul.f32 0.01, %v552_v19  ;;  %v625_v25 = vsel %vm593_vm4, %v549_v14, %v609_v18 }
 0x23c   :  { %vm592_vm7 = vcmp.gt.f32.partialorder %v544_v22, 0.0  ;;  %v608_v24 = vmul.f32 0.01, %v544_v22  ;;  %v623_v27 = vsel %vm591_vm5, %v541_v16, %v607_v21 }
 0x23d   :  { %v626_v26 = vsel %vm594_vm6, %v552_v19, %v610_v23 }
 0x23e   :  { %v624_v28 = vsel %vm592_vm7, %v544_v22, %v608_v24  ;;  %v638_v29 = vpack.c.bf16 %v626_v26, %v625_v25 }
 0x23f   :  { %v637_v30 = vpack.c.bf16 %v624_v28, %v623_v27 }
 0x241   :  { %1029 = vmatprep.mubr.bf16.mxu1 %v637_v30 }
 0x242   :  { %1030 = vmatmul.mubr.bf16.gmra.mrb[20].mxu1 %v638_v29 }
 0x246   :  { %v1003_v31 = vpop.f32.mrb[8].mxu1 }
 0x247   :  { %v565_v32 = vadd.f32 %v1003_v31, %v1341_v10  ;;  %v556_v33 = vpop.f32.mrb[9].mxu1 }
 0x248   :  { %v557_v34 = vadd.f32 %v1341_v10, %v556_v33  ;;  %v1004_v35 = vpop.f32.mrb[10].mxu1 }
 0x249   :  { %v613_v36 = vmul.f32 0.01, %v565_v32  ;;  %v568_v37 = vadd.f32 %v1004_v35, %v1341_v10  ;;  %v559_v38 = vpop.f32.mrb[11].mxu1  ;;  %vm597_vm8 = vcmp.gt.f32.partialorder %v565_v32, 0.0 }
 0x24a   :  { %v611_v39 = vmul.f32 0.01, %v557_v34  ;;  %v560_v40 = vadd.f32 %v1341_v10, %v559_v38  ;;  %vm595_vm9 = vcmp.gt.f32.partialorder %v557_v34, 0.0 }
 0x24b   :  { %vm598_vm10 = vcmp.gt.f32.partialorder %v568_v37, 0.0  ;;  %v614_v41 = vmul.f32 0.01, %v568_v37  ;;  %v629_v43 = vsel %vm597_vm8, %v565_v32, %v613_v36 }
 0x24c   :  { %vm596_vm11 = vcmp.gt.f32.partialorder %v560_v40, 0.0  ;;  %v612_v42 = vmul.f32 0.01, %v560_v40  ;;  %v627_v45 = vsel %vm595_vm9, %v557_v34, %v611_v39 }
 0x24d   :  { %v630_v44 = vsel %vm598_vm10, %v568_v37, %v614_v41 }
 0x24e   :  { %v628_v46 = vsel %vm596_vm11, %v560_v40, %v612_v42  ;;  %v640_v47 = vpack.c.bf16 %v630_v44, %v629_v43 }
 0x24f   :  { %v639_v48 = vpack.c.bf16 %v628_v46, %v627_v45 }
 0x251   :  { %1033 = vmatprep.mubr.bf16.mxu1 %v639_v48 }
 0x252   :  { %1034 = vmatmul.mubr.bf16.gmra.mrb[24].mxu1 %v640_v47 }
 0x256   :  { %v1007_v49 = vpop.f32.mrb[12].mxu1 }
 0x257   :  { %v581_v50 = vadd.f32 %v1007_v49, %v1341_v10  ;;  %v572_v51 = vpop.f32.mrb[13].mxu1 }
 0x258   :  { %v573_v52 = vadd.f32 %v1341_v10, %v572_v51  ;;  %v1008_v53 = vpop.f32.mrb[14].mxu1 }
 0x259   :  { %v617_v54 = vmul.f32 0.01, %v581_v50  ;;  %v584_v55 = vadd.f32 %v1008_v53, %v1341_v10  ;;  %v575_v56 = vpop.f32.mrb[15].mxu1  ;;  %vm601_vm12 = vcmp.gt.f32.partialorder %v581_v50, 0.0 }
 0x25a   :  { %v615_v57 = vmul.f32 0.01, %v573_v52  ;;  %v576_v58 = vadd.f32 %v1341_v10, %v575_v56  ;;  %vm599_vm13 = vcmp.gt.f32.partialorder %v573_v52, 0.0 }
 0x25b   :  { %vm602_vm14 = vcmp.gt.f32.partialorder %v584_v55, 0.0  ;;  %v618_v59 = vmul.f32 0.01, %v584_v55  ;;  %v633_v61 = vsel %vm601_vm12, %v581_v50, %v617_v54 }
 0x25c   :  { %vm600_vm15 = vcmp.gt.f32.partialorder %v576_v58, 0.0  ;;  %v616_v60 = vmul.f32 0.01, %v576_v58  ;;  %v631_v63 = vsel %vm599_vm13, %v573_v52, %v615_v57 }
 0x25d   :  { %v634_v62 = vsel %vm602_vm14, %v584_v55, %v618_v59 }
 0x25e   :  { %v632_v0 = vsel %vm600_vm15, %v576_v58, %v616_v60  ;;  %v642_v1 = vpack.c.bf16 %v634_v62, %v633_v61 }
 0x25f   :  { %v641_v2 = vpack.c.bf16 %v632_v0, %v631_v63 }
 0x261   :  { %1037 = vmatprep.mubr.bf16.mxu1 %v641_v2 }
 0x262   :  { %1038 = vmatmul.mubr.bf16.gmra.mrb[28].mxu1 %v642_v1 }
 0x305   :  { %v1027_v4 = vpop.f32.mrb[16].mxu1 }
 0x306   :  { %v757_v5 = vadd.f32 %v1027_v4, %v872_v3  ;;  %v748_v10 = vpop.f32.mrb[17].mxu1 }
 0x307   :  { %v749_v6 = vadd.f32 %v872_v3, %v748_v10  ;;  %v1028_v7 = vpop.f32.mrb[18].mxu1 }
 0x308   :  { %813 = vst [vmem:[#allocation10 + $0x10] sm:$0xff] %v757_v5  ;;  %v760_v8 = vadd.f32 %v1028_v7, %v872_v3  ;;  %v751_v9 = vpop.f32.mrb[19].mxu1 }
 0x309   :  { %811 = vst [vmem:[#allocation10] sm:$0xff] %v749_v6  ;;  %v752_v11 = vadd.f32 %v872_v3, %v751_v9 }
 0x30a   :  { %814 = vst [vmem:[#allocation10 + $0x18] sm:$0xff] %v760_v8 }
 0x30b   :  { %812 = vst [vmem:[#allocation10 + $0x8] sm:$0xff] %v752_v11 }
 0x315   :  { %v1031_v12 = vpop.f32.mrb[20].mxu1 }
 0x316   :  { %v773_v13 = vadd.f32 %v1031_v12, %v872_v3  ;;  %v764_v14 = vpop.f32.mrb[21].mxu1 }
 0x317   :  { %v765_v15 = vadd.f32 %v872_v3, %v764_v14  ;;  %v1032_v16 = vpop.f32.mrb[22].mxu1 }
 0x318   :  { %817 = vst [vmem:[#allocation10 + $0x30] sm:$0xff] %v773_v13  ;;  %v776_v17 = vadd.f32 %v1032_v16, %v872_v3  ;;  %v767_v18 = vpop.f32.mrb[23].mxu1 }
 0x319   :  { %815 = vst [vmem:[#allocation10 + $0x20] sm:$0xff] %v765_v15  ;;  %v768_v19 = vadd.f32 %v872_v3, %v767_v18 }
 0x31a   :  { %818 = vst [vmem:[#allocation10 + $0x38] sm:$0xff] %v776_v17 }
 0x31b   :  { %816 = vst [vmem:[#allocation10 + $0x28] sm:$0xff] %v768_v19 }
 0x325   :  { %v1035_v20 = vpop.f32.mrb[24].mxu1 }
 0x326   :  { %v789_v21 = vadd.f32 %v1035_v20, %v872_v3  ;;  %v780_v22 = vpop.f32.mrb[25].mxu1 }
 0x327   :  { %v781_v23 = vadd.f32 %v872_v3, %v780_v22  ;;  %v1036_v24 = vpop.f32.mrb[26].mxu1 }
 0x328   :  { %821 = vst [vmem:[#allocation10 + $0x50] sm:$0xff] %v789_v21  ;;  %v792_v25 = vadd.f32 %v1036_v24, %v872_v3  ;;  %v783_v26 = vpop.f32.mrb[27].mxu1 }
 0x329   :  { %819 = vst [vmem:[#allocation10 + $0x40] sm:$0xff] %v781_v23  ;;  %v784_v27 = vadd.f32 %v872_v3, %v783_v26 }
 0x32a   :  { %822 = vst [vmem:[#allocation10 + $0x58] sm:$0xff] %v792_v25 }
 0x32b   :  { %820 = vst [vmem:[#allocation10 + $0x48] sm:$0xff] %v784_v27 }
 0x335   :  { %v1039_v28 = vpop.f32.mrb[28].mxu1 }
 0x336   :  { %v805_v29 = vadd.f32 %v1039_v28, %v872_v3  ;;  %v796_v30 = vpop.f32.mrb[29].mxu1 }
 0x337   :  { %v797_v31 = vadd.f32 %v872_v3, %v796_v30  ;;  %v1040_v32 = vpop.f32.mrb[30].mxu1 }
 0x338   :  { %825 = vst [vmem:[#allocation10 + $0x70] sm:$0xff] %v805_v29  ;;  %v808_v33 = vadd.f32 %v1040_v32, %v872_v3  ;;  %v799_v34 = vpop.f32.mrb[31].mxu1 }
 0x339   :  { %823 = vst [vmem:[#allocation10 + $0x60] sm:$0xff] %v797_v31  ;;  %v800_v35 = vadd.f32 %v872_v3, %v799_v34 }
 0x33a   :  { %826 = vst [vmem:[#allocation10 + $0x78] sm:$0xff] %v808_v33 }
 0x33b   :  { %824 = vst [vmem:[#allocation10 + $0x68] sm:$0xff] %v800_v35 }
 0x33c   :  { %1183 = shalt.err (!%p1180_p8)
}
 0x33d   :  { %s1184_s10 = scalar_lea.hbm %s1381_s7, 2048 }
 0x33e   :  { %p1185_p9 = scmp.ne.s32.totalorder %s1381_s7, %s1184_s10  ;;  %p1188_p10 = scmp.lt.u32.totalorder %s1184_s10, %s1381_s7 }
 0x340   :  { %p1190_p11 = pnand %p1188_p10, %p1185_p9 }
 0x342   :  { %1193 = shalt.err (!%p1190_p11)
}
 0x343   :  { %s1211_s18 = smov 128   ;;  %s1212_s0 = smov 8  }
 0x344   :  { %838 = dma.vmem_to_hbm [thread:$0]  %s833_s29, 2048, %s1381_s7, [#allocation4], %s1211_s18, %s1211_s18, %s1212_s0  }
 0x345   :  { %1200 = dma.done.wait [#allocation4], 2048  }
 0x346   :  { %1201 = vsyncadd [#allocation4], 4294965248 }
 0x347   :  { %842 = vsyncpa [#allocation3], 1 }
 0x348   :  { %843 = vsyncpa [#allocation6], 1 }
 0x349   :  { %844 = vsyncpa [#allocation9], 1 }
 0x34a   :  { %845 = vsyncpa [#allocation4], 1 }

</bundles_post_ra>
